<compile_context>
chip_gen: v5e
topology: v5e:2x2
jax: 0.10.0
libtpu: 0.0.40
codegen_flags: <defaults>
</compile_context>

<pallas_src>
import functools

import jax
import jax.numpy as jnp
from jax.experimental import pallas as pl
from jax.experimental.pallas import tpu as pltpu


def _dpo_kernel(*refs, beta, label_smoothing, ipo, use_weights):
    if use_weights:
        pc_ref, pr_ref, rc_ref, rr_ref, w_ref, out_ref = refs
    else:
        pc_ref, pr_ref, rc_ref, rr_ref, out_ref = refs
        w_ref = None

    pc = pc_ref[...]   # (1, B) policy_chosen_logps
    pr = pr_ref[...]   # (N, B) policy_rejected_logps
    rc = rc_ref[...]   # (1, B) reference_chosen_logps
    rr = rr_ref[...]   # (N, B) reference_rejected_logps
    n, b = pr.shape    # static trace-time ints

    # chosen row broadcasts over the rejected (sublane) axis
    logits = (pc - pr) - (rc - rr)               # (N, B)

    if ipo:
        losses = (logits - 1.0 / (2.0 * beta)) ** 2
    else:
        bl = beta * logits
        # Fused stable log-sigmoid pair:
        #   -logsig( bl) = max(-bl,0) + log1p(exp(-|bl|))
        #   -logsig(-bl) = max( bl,0) + log1p(exp(-|bl|))
        # -> 1 exp + 1 log1p per element (EUP), shared between both terms.
        shared = jnp.log1p(jnp.exp(-jnp.abs(bl)))
        if label_smoothing != 0.0:
            losses = ((1.0 - label_smoothing) * jnp.maximum(-bl, 0.0)
                      + label_smoothing * jnp.maximum(bl, 0.0)
                      + shared)
        else:
            losses = jnp.maximum(-bl, 0.0) + shared

    rejected_rewards = beta * (pr - rr)          # (N, B)

    if use_weights:
        w = w_ref[...]
        # Column partials computed once and reused (one fewer full XLU pass).
        w_col = jnp.sum(w, axis=0, keepdims=True)                    # (1, B)
        lw_col = jnp.sum(losses * w, axis=0, keepdims=True)          # (1, B)
        loss = jnp.sum(lw_col) / (jnp.sum(w_col) + 1e-8)
        rrm = (jnp.sum(rejected_rewards * w, axis=0, keepdims=True)
               / (w_col + 1e-8))
    else:
        loss = jnp.sum(losses) * (1.0 / float(n * b))
        rrm = jnp.sum(rejected_rewards, axis=0, keepdims=True) * (1.0 / float(n))

    # Single packed output: row 0 = loss (broadcast), row 1 = chosen_rewards,
    # row 2 = rejected_rewards_mean.  One output DMA instead of three.
    out_ref[0:1, :] = jnp.full((1, b), loss, dtype=jnp.float32)
    out_ref[1:2, :] = beta * (pc - rc)
    out_ref[2:3, :] = rrm


def dpo_loss(policy_chosen_logps, policy_rejected_logps,
             reference_chosen_logps, reference_rejected_logps,
             rejected_weights=None, *, beta=0.1, label_smoothing=0.0, ipo=False):
    """Pallas implementation of DPOLoss.forward.

    policy_chosen_logps / reference_chosen_logps: (B,) float32
    policy_rejected_logps / reference_rejected_logps: (N, B) float32
    rejected_weights: optional (N, B) float32
    Returns (loss scalar, chosen_rewards (B,), rejected_rewards_mean (B,))
    """
    n, b = policy_rejected_logps.shape
    f32 = jnp.float32

    # Raw inputs, no wrapper-side padding: full-array BlockSpecs are exempt
    # from the (8,128) divisibility rule and Mosaic pads the layout itself.
    inputs = [
        policy_chosen_logps.astype(f32).reshape(1, b),
        policy_rejected_logps.astype(f32),
        reference_chosen_logps.astype(f32).reshape(1, b),
        reference_rejected_logps.astype(f32),
    ]
    use_weights = rejected_weights is not None
    if use_weights:
        inputs.append(rejected_weights.astype(f32))

    kernel = functools.partial(
        _dpo_kernel,
        beta=float(beta),
        label_smoothing=float(label_smoothing),
        ipo=bool(ipo),
        use_weights=use_weights,
    )

    # Advisory cost estimate with the true (unpadded) HBM footprint.
    elems = n * b
    in_bytes = 4 * (2 * elems + 2 * b + (elems if use_weights else 0))
    out_bytes = 4 * 3 * b
    cost = pl.CostEstimate(
        flops=12 * elems,
        transcendentals=(0 if ipo else 2 * elems),
        bytes_accessed=in_bytes + out_bytes,
    )

    # Resident VMEM estimate (layout-padded to (8,128) tiles) to decide whether
    # the v5e 16 MiB default scoped limit needs raising; tiny inputs keep the
    # compiler defaults untouched.
    def _padded_bytes(shape):
        rows = -(-shape[0] // 8) * 8
        cols = -(-shape[1] // 128) * 128
        return 4 * rows * cols

    resident = sum(_padded_bytes(x.shape) for x in inputs) + _padded_bytes((3, b))
    compiler_params = None
    if 4 * resident > (8 << 20):      # generous headroom for intermediates
        compiler_params = pltpu.CompilerParams(
            vmem_limit_bytes=min(4 * resident, 100 << 20))

    vmem = pl.BlockSpec(memory_space=pltpu.MemorySpace.VMEM)
    out = pl.pallas_call(
        kernel,
        out_shape=jax.ShapeDtypeStruct((3, b), f32),
        in_specs=[vmem] * len(inputs),
        out_specs=vmem,
        cost_estimate=cost,
        compiler_params=compiler_params,
    )(*inputs)

    return out[0, 0], out[1, :], out[2, :]


def _dpo_loss_ref(pc, pr, rc, rr, w=None, *, beta=0.1, label_smoothing=0.0, ipo=False):
    """Pure-JAX reference mirroring the PyTorch forward."""
    n = pr.shape[0]
    pce = jnp.broadcast_to(pc[None, :], (n, pc.shape[0]))
    rce = jnp.broadcast_to(rc[None, :], (n, rc.shape[0]))
    logits = (pce - pr) - (rce - rr)
    if ipo:
        losses = (logits - 1.0 / (2.0 * beta)) ** 2
    else:
        losses = (-jax.nn.log_sigmoid(beta * logits) * (1.0 - label_smoothing)
                  - jax.nn.log_sigmoid(-beta * logits) * label_smoothing)
    rej_rewards = beta * (pr - rr)
    if w is not None:
        losses = losses * w
        loss = losses.sum() / (w.sum() + 1e-8)
        rrm = (rej_rewards * w).sum(0) / (w.sum(0) + 1e-8)
    else:
        loss = losses.mean()
        rrm = rej_rewards.mean(0)
    return loss, beta * (pc - rc), rrm


if __name__ == "__main__":
    key = jax.random.PRNGKey(0)
    k1, k2, k3, k4, k5 = jax.random.split(key, 5)

    N_AUG, B = 4, 8      # 4 rejected samples per chosen, batch 8
    beta = 0.1
    label_smoothing = 0.05

    policy_chosen = jax.random.normal(k1, (B,), jnp.float32) - 5.0
    policy_rejected = jax.random.normal(k2, (N_AUG, B), jnp.float32) - 6.0
    reference_chosen = jax.random.normal(k3, (B,), jnp.float32) - 5.0
    reference_rejected = jax.random.normal(k4, (N_AUG, B), jnp.float32) - 6.0
    # binary validity weights with some invalid (zero) entries
    rejected_weights = (jax.random.uniform(k5, (N_AUG, B)) > 0.3).astype(jnp.float32)

    # --- weighted, label-smoothed sigmoid path ---
    loss, cr, rrm = dpo_loss(
        policy_chosen, policy_rejected, reference_chosen, reference_rejected,
        rejected_weights, beta=beta, label_smoothing=label_smoothing, ipo=False)
    jax.block_until_ready((loss, cr, rrm))
    loss_r, cr_r, rrm_r = _dpo_loss_ref(
        policy_chosen, policy_rejected, reference_chosen, reference_rejected,
        rejected_weights, beta=beta, label_smoothing=label_smoothing, ipo=False)
    assert jnp.allclose(loss, loss_r, atol=1e-5, rtol=1e-5)
    assert jnp.allclose(cr, cr_r, atol=1e-5, rtol=1e-5)
    assert jnp.allclose(rrm, rrm_r, atol=1e-5, rtol=1e-5)

    # --- unweighted (mean) path, no label smoothing ---
    loss2, cr2, rrm2 = dpo_loss(
        policy_chosen, policy_rejected, reference_chosen, reference_rejected,
        None, beta=beta, ipo=False)
    jax.block_until_ready((loss2, cr2, rrm2))
    loss2_r, cr2_r, rrm2_r = _dpo_loss_ref(
        policy_chosen, policy_rejected, reference_chosen, reference_rejected,
        None, beta=beta, ipo=False)
    assert jnp.allclose(loss2, loss2_r, atol=1e-5, rtol=1e-5)
    assert jnp.allclose(cr2, cr2_r, atol=1e-5, rtol=1e-5)
    assert jnp.allclose(rrm2, rrm2_r, atol=1e-5, rtol=1e-5)

    # --- IPO path (weighted) ---
    loss3, cr3, rrm3 = dpo_loss(
        policy_chosen, policy_rejected, reference_chosen, reference_rejected,
        rejected_weights, beta=beta, ipo=True)
    jax.block_until_ready((loss3, cr3, rrm3))
    loss3_r, cr3_r, rrm3_r = _dpo_loss_ref(
        policy_chosen, policy_rejected, reference_chosen, reference_rejected,
        rejected_weights, beta=beta, ipo=True)
    assert jnp.allclose(loss3, loss3_r, atol=1e-5, rtol=1e-5)
    assert jnp.allclose(cr3, cr3_r, atol=1e-5, rtol=1e-5)
    assert jnp.allclose(rrm3, rrm3_r, atol=1e-5, rtol=1e-5)

    print("KERNEL_OK")
</pallas_src>

<mosaic_0001>
module attributes {stable_mosaic.version = 11 : i64} {
  func.func @_dpo_kernel(%arg0: memref<1x8xf32, #tpu.memory_space<vmem>>, %arg1: memref<4x8xf32, #tpu.memory_space<vmem>>, %arg2: memref<1x8xf32, #tpu.memory_space<vmem>>, %arg3: memref<4x8xf32, #tpu.memory_space<vmem>>, %arg4: memref<4x8xf32, #tpu.memory_space<vmem>>, %arg5: memref<3x8xf32, #tpu.memory_space<vmem>>) attributes {dimension_semantics = [], scalar_prefetch = 0 : i64, scratch_operands = 0 : i64, tpu.core_type = #tpu.core_type<tc>} {
    %c0 = arith.constant 0 : index
    %c0_0 = arith.constant 0 : index
    %0 = vector.load %arg0[%c0, %c0_0] : memref<1x8xf32, #tpu.memory_space<vmem>>, vector<1x8xf32>
    %c0_1 = arith.constant 0 : index
    %c0_2 = arith.constant 0 : index
    %1 = vector.load %arg1[%c0_1, %c0_2] : memref<4x8xf32, #tpu.memory_space<vmem>>, vector<4x8xf32>
    %c0_3 = arith.constant 0 : index
    %c0_4 = arith.constant 0 : index
    %2 = vector.load %arg2[%c0_3, %c0_4] : memref<1x8xf32, #tpu.memory_space<vmem>>, vector<1x8xf32>
    %c0_5 = arith.constant 0 : index
    %c0_6 = arith.constant 0 : index
    %3 = vector.load %arg3[%c0_5, %c0_6] : memref<4x8xf32, #tpu.memory_space<vmem>>, vector<4x8xf32>
    %4 = vector.broadcast %0 : vector<1x8xf32> to vector<4x8xf32>
    %5 = arith.subf %4, %1 : vector<4x8xf32>
    %6 = vector.broadcast %2 : vector<1x8xf32> to vector<4x8xf32>
    %7 = arith.subf %6, %3 : vector<4x8xf32>
    %8 = arith.subf %5, %7 : vector<4x8xf32>
    %cst = arith.constant 1.000000e-01 : f32
    %9 = vector.broadcast %cst : f32 to vector<4x8xf32>
    %10 = arith.mulf %9, %8 : vector<4x8xf32>
    %11 = math.absf %10 : vector<4x8xf32>
    %cst_7 = arith.constant 0.000000e+00 : f32
    %12 = vector.broadcast %cst_7 : f32 to vector<4x8xf32>
    %13 = arith.subf %12, %11 : vector<4x8xf32>
    %14 = math.exp %13 : vector<4x8xf32>
    %15 = math.log1p %14 : vector<4x8xf32>
    %cst_8 = arith.constant 0.000000e+00 : f32
    %16 = vector.broadcast %cst_8 : f32 to vector<4x8xf32>
    %17 = arith.subf %16, %10 : vector<4x8xf32>
    %cst_9 = arith.constant 0.000000e+00 : f32
    %18 = vector.broadcast %cst_9 : f32 to vector<4x8xf32>
    %19 = arith.maximumf %17, %18 : vector<4x8xf32>
    %cst_10 = arith.constant 0.949999988 : f32
    %20 = vector.broadcast %cst_10 : f32 to vector<4x8xf32>
    %21 = arith.mulf %20, %19 : vector<4x8xf32>
    %cst_11 = arith.constant 0.000000e+00 : f32
    %22 = vector.broadcast %cst_11 : f32 to vector<4x8xf32>
    %23 = arith.maximumf %10, %22 : vector<4x8xf32>
    %cst_12 = arith.constant 5.000000e-02 : f32
    %24 = vector.broadcast %cst_12 : f32 to vector<4x8xf32>
    %25 = arith.mulf %24, %23 : vector<4x8xf32>
    %26 = arith.addf %21, %25 : vector<4x8xf32>
    %27 = arith.addf %26, %15 : vector<4x8xf32>
    %28 = arith.subf %1, %3 : vector<4x8xf32>
    %cst_13 = arith.constant 1.000000e-01 : f32
    %29 = vector.broadcast %cst_13 : f32 to vector<4x8xf32>
    %30 = arith.mulf %29, %28 : vector<4x8xf32>
    %c0_14 = arith.constant 0 : index
    %c0_15 = arith.constant 0 : index
    %31 = vector.load %arg4[%c0_14, %c0_15] : memref<4x8xf32, #tpu.memory_space<vmem>>, vector<4x8xf32>
    %cst_16 = arith.constant dense<0.000000e+00> : vector<8xf32>
    %32 = vector.multi_reduction <add>, %31, %cst_16 [0] : vector<4x8xf32> to vector<8xf32>
    %33 = vector.shape_cast %32 : vector<8xf32> to vector<1x8xf32>
    %34 = arith.mulf %27, %31 : vector<4x8xf32>
    %cst_17 = arith.constant dense<0.000000e+00> : vector<8xf32>
    %35 = vector.multi_reduction <add>, %34, %cst_17 [0] : vector<4x8xf32> to vector<8xf32>
    %36 = vector.shape_cast %35 : vector<8xf32> to vector<1x8xf32>
    %37 = vector.shape_cast %36 : vector<1x8xf32> to vector<1x1x8xf32>
    %cst_18 = arith.constant dense<0.000000e+00> : vector<1xf32>
    %38 = vector.multi_reduction <add>, %37, %cst_18 [1, 2] : vector<1x1x8xf32> to vector<1xf32>
    %39 = vector.shape_cast %38 : vector<1xf32> to vector<1x1x1xf32>
    %40 = vector.extract %39[0, 0, 0] : f32 from vector<1x1x1xf32>
    %41 = vector.shape_cast %33 : vector<1x8xf32> to vector<1x1x8xf32>
    %cst_19 = arith.constant dense<0.000000e+00> : vector<1xf32>
    %42 = vector.multi_reduction <add>, %41, %cst_19 [1, 2] : vector<1x1x8xf32> to vector<1xf32>
    %43 = vector.shape_cast %42 : vector<1xf32> to vector<1x1x1xf32>
    %44 = vector.extract %43[0, 0, 0] : f32 from vector<1x1x1xf32>
    %cst_20 = arith.constant 9.99999993E-9 : f32
    %45 = arith.addf %44, %cst_20 : f32
    %46 = arith.divf %40, %45 : f32
    %47 = arith.mulf %30, %31 : vector<4x8xf32>
    %cst_21 = arith.constant dense<0.000000e+00> : vector<8xf32>
    %48 = vector.multi_reduction <add>, %47, %cst_21 [0] : vector<4x8xf32> to vector<8xf32>
    %49 = vector.shape_cast %48 : vector<8xf32> to vector<1x8xf32>
    %cst_22 = arith.constant 9.99999993E-9 : f32
    %50 = vector.broadcast %cst_22 : f32 to vector<1x8xf32>
    %51 = arith.addf %33, %50 : vector<1x8xf32>
    %52 = arith.divf %49, %51 : vector<1x8xf32>
    %53 = vector.broadcast %46 : f32 to vector<1x8xf32>
    %c0_23 = arith.constant 0 : index
    %c0_24 = arith.constant 0 : index
    %54 = vector.load %arg5[%c0_23, %c0_24] : memref<3x8xf32, #tpu.memory_space<vmem>>, vector<1x8xf32>
    tpu.vector_store %arg5[%c0_23, %c0_24], %53 {strides = array<i32>} : memref<3x8xf32, #tpu.memory_space<vmem>>, vector<1x8xf32>,
    %55 = arith.subf %0, %2 : vector<1x8xf32>
    %cst_25 = arith.constant 1.000000e-01 : f32
    %56 = vector.broadcast %cst_25 : f32 to vector<1x8xf32>
    %57 = arith.mulf %56, %55 : vector<1x8xf32>
    %c1 = arith.constant 1 : index
    %c0_26 = arith.constant 0 : index
    %58 = vector.load %arg5[%c1, %c0_26] : memref<3x8xf32, #tpu.memory_space<vmem>>, vector<1x8xf32>
    tpu.vector_store %arg5[%c1, %c0_26], %57 {strides = array<i32>} : memref<3x8xf32, #tpu.memory_space<vmem>>, vector<1x8xf32>,
    %c2 = arith.constant 2 : index
    %c0_27 = arith.constant 0 : index
    %59 = vector.load %arg5[%c2, %c0_27] : memref<3x8xf32, #tpu.memory_space<vmem>>, vector<1x8xf32>
    tpu.vector_store %arg5[%c2, %c0_27], %52 {strides = array<i32>} : memref<3x8xf32, #tpu.memory_space<vmem>>, vector<1x8xf32>,
    return
  }
}

</mosaic_0001>

<bundles_post_ra>
// kernel: tpu_custom_call.1
= control target key start
LH: loop header
LB: loop body
LE: loop exit
PB: predicated region body
PF: predicated region fallthrough
CT: control target
= control target key end

     0   :  { %10 = vsyncpa [#allocation3], 0  ;;  %s437_s0 = inlined_call_operand.hbm [shape: f32[1,8], index: 0, kind: input, shape index: {}]   ;;  %s438_s1 = inlined_call_operand.hbm [shape: f32[4,8], index: 1, kind: input, shape index: {}]   ;;  %s439_s2 = inlined_call_operand.vmem [shape: f32[1,8], index: 2, kind: input, shape index: {}]   ;;  %s440_s3 = inlined_call_operand.hbm [shape: f32[4,8], index: 3, kind: input, shape index: {}]   ;;  %s441_s4 = inlined_call_operand.hbm [shape: f32[4,8], index: 4, kind: input, shape index: {}]   ;;  %s442_s5 = inlined_call_operand.hbm [shape: f32[3,8], index: 5, kind: output, shape index: {}]  }
   0x1   :  { %11 = vsyncpa [#allocation6], 0 }
   0x2   :  { %12 = vsyncpa [#allocation9], 0  ;;  %s30_s20 = sshll.u32 %s438_s1, 4  ;;  %s31_s20 = int_to_ptr.hbm [resolvable:$true] %s30_s20 }
   0x3   :  { %13 = vsyncpa [#allocation4], 0  ;;  %s366_s21 = smov [#allocation5]   ;;  %s19_s25 = sshll.u32 %s437_s0, 4  ;;  %s20_s25 = int_to_ptr.hbm [resolvable:$true] %s19_s25 }
   0x4   :  { %s32_s22 = sshll.u32 %s366_s21, 4  ;;  %s367_s26 = smov [#allocation2]   ;;  %s33_s22 = int_to_ptr.vmem [resolvable:$true] %s32_s22 }
   0x5   :  { %35 = dma.hbm_to_vmem [thread:$0]  %s31_s20, 64, %s33_s22, [#allocation6]  }
   0x6   :  { %s21_s27 = sshll.u32 %s367_s26, 4  ;;  %s43_s30 = sshll.u32 %s440_s3, 4  ;;  %s22_s27 = int_to_ptr.vmem [resolvable:$true] %s21_s27  ;;  %s44_s30 = int_to_ptr.hbm [resolvable:$true] %s43_s30 }
   0x7   :  { %24 = dma.hbm_to_vmem [thread:$0]  %s20_s25, 16, %s22_s27, [#allocation3]  }
   0x8   :  { %s54_s7 = sshll.u32 %s441_s4, 4  ;;  %s368_s8 = smov [#allocation7]   ;;  %s55_s7 = int_to_ptr.hbm [resolvable:$true] %s54_s7 }
   0x9   :  { %s45_s9 = sshll.u32 %s368_s8, 4  ;;  %s369_s0 = smov [#allocation8]   ;;  %s46_s9 = int_to_ptr.vmem [resolvable:$true] %s45_s9 }
   0xa   :  { %48 = dma.hbm_to_vmem [thread:$0]  %s44_s30, 64, %s46_s9, [#allocation6]  }
   0xb   :  { %s56_s10 = sshll.u32 %s369_s0, 4  ;;  %s57_s10 = int_to_ptr.vmem [resolvable:$true] %s56_s10 }
   0xc   :  { %59 = dma.hbm_to_vmem [thread:$0]  %s55_s7, 64, %s57_s10, [#allocation9]  }
   0xd   :  { %358 = dma.done.wait [#allocation3], 16  }
   0xe   :  { %359 = vsyncadd [#allocation3], 4294967280 }
   0xf   :  { %360 = dma.done.wait [#allocation6], 128  }
  0x10   :  { %361 = vsyncadd [#allocation6], 4294967168 }
  0x11   :  { %362 = dma.done.wait [#allocation9], 64  }
  0x12   :  { %363 = vsyncadd [#allocation9], 4294967232  ;;  %v77_v0 = vld [vmem:[#allocation5] sm:$0xf]  ;;  %v79_v1 = vld [vmem:[#allocation7] sm:$0xf] }
  0x13   :  { %v228_v2 = vld [vmem:[#allocation2] ss:$0 sm:$0xff]  ;;  %v110_v4 = vsub.f32 %v77_v0, %v79_v1  ;;  %v112_v14 = vld [vmem:[#allocation8] sm:$0xf]  ;;  %vm113_vm0 = vcmask 60416   ;;  %vm129_vm2 = vcmask 57344  }
  0x14   :  { %v229_v3 = vld [vmem:[%s439_s2] ss:$0 sm:$0xff]  ;;  %v83_v5 = vsub.f32 %v228_v2, %v77_v0  ;;  %v114_v29 = vsel %vm113_vm0, %v112_v14, 0.0  ;;  %s370_s16 = smov [#allocation10]   ;;  %s205_s19 = sshll.u32 %s442_s5, 4  ;;  %s206_s19 = int_to_ptr.hbm [resolvable:$true] %s205_s19 }
  0x15   :  { %v87_v6 = vsub.f32 %v229_v3, %v79_v1  ;;  %v111_v12 = vmul.f32 0.1, %v110_v4  ;;  %v115_v32 = vrot.slane %v114_v29, 4  ;;  %s203_s17 = sshll.u32 %s370_s16, 4  ;;  %s204_s17 = int_to_ptr.vmem [resolvable:$true] %s203_s17 }
  0x17   :  { %v88_v7 = vsub.f32 %v83_v5, %v87_v6  ;;  %v168_v15 = vmul.f32 %v112_v14, %v111_v12  ;;  %v116_v35 = vadd.f32 %v115_v32, %v114_v29 }
  0x19   :  { %v89_v8 = vmul.f32 0.1, %v88_v7  ;;  %v417_v17 = vsel %vm113_vm0, %v168_v15, 0.0  ;;  %v117_v39 = vrot.slane %v116_v35, 2 }
  0x1b   :  { %v90_v9 = vand.u32 2147483647, %v89_v8  ;;  %v103_v13 = vsub.f32 0.0, %v89_v8  ;;  %v106_v21 = vmax.f32 %v89_v8, 0.0  ;;  %v118_v42 = vadd.f32 %v117_v39, %v116_v35 }
  0x1c   :  { %v170_v8 = vrot.slane %v417_v17, 4 }
  0x1d   :  { %v91_v10 = vsub.f32 0.0, %v90_v9  ;;  %v104_v20 = vmax.f32 %v103_v13, 0.0  ;;  %v107_v25 = vmul.f32 0.05, %v106_v21  ;;  %v119_v45 = vrot.slane %v118_v42, 1 }
  0x1e   :  { %v171_v13 = vadd.f32 %v170_v8, %v417_v17 }
  0x1f   :  { %v92_v11 = vmul.f32 1.442695, %v91_v10  ;;  %v105_v24 = vmul.f32 0.95, %v104_v20  ;;  %v120_v47 = vadd.f32 %v119_v45, %v118_v42 }
  0x20   :  { %v172_v15 = vrot.slane %v171_v13, 2 }
  0x21   :  { %230 = vpow2.f32 %v92_v11  ;;  %v108_v28 = vadd.f32 %v107_v25, %v105_v24  ;;  %v140_v48 = vsel %vm129_vm2, %v120_v47, 0.0  ;;  %v176_v1 = vadd.f32 1e-08, %v120_v47 }
  0x23   :  { %vm182_vm7 = vweird.f32 %v176_v1 }
  0x27   :  { %v231_v16 = vpop.eup %230 }
  0x28   :  { %v94_v18 = vadd.f32 1.0, %v231_v16  ;;  %v97_v19 = vmul.f32 -0.5, %v231_v16  ;;  %v100_v23 = vand.u32 2147483647, %v231_v16 }
  0x2a   :  { %232 = vlog2.f32 %v94_v18  ;;  %v98_v22 = vadd.f32 1.0, %v97_v19  ;;  %vm101_vm1 = vcmp.lt.f32.partialorder %v100_v23, 0.0004427343  ;;  %v173_v18 = vadd.f32 %v172_v15, %v171_v13  ;;  %v78_v23 = vld [vmem:[%s439_s2] sm:$0x1] }
  0x2b   :  { %v188_v19 = vand.u32 2147483648, %v176_v1 }
  0x2c   :  { %v99_v26 = vmul.f32 %v231_v16, %v98_v22  ;;  %v174_v21 = vrot.slane %v173_v18, 1  ;;  %v76_v22 = vld [vmem:[#allocation2] sm:$0x1] }
  0x2d   :  { %v189_v24 = vor.u32 1.1754944e-38, %v188_v19 }
  0x2e   :  { %v175_v17 = vadd.f32 %v174_v21, %v173_v18 }
  0x30   :  { %v233_v27 = vpop.eup %232 }
  0x31   :  { %v96_v30 = vmul.f32 0.6931472, %v233_v27 }
  0x33   :  { %v102_v31 = vsel %vm101_vm1, %v99_v26, %v96_v30  ;;  %v186_v26 = vand.u32 2147483647, %v176_v1 }
  0x34   :  { %v109_v33 = vadd.f32 %v108_v28, %v102_v31  ;;  %v194_v28 = vsub.f32 %v76_v22, %v78_v23 }
  0x35   :  { %vm187_vm10 = vcmp.eq.f32.partialorder %v186_v26, 8.507059e+37 }
  0x36   :  { %v121_v34 = vmul.f32 %v112_v14, %v109_v33  ;;  %v195_v31 = vmul.f32 0.1, %v194_v28 }
  0x38   :  { %v122_v36 = vsel %vm113_vm0, %v121_v34, 0.0  ;;  %196 = vst.msk [vmem:[#allocation10 + $0x1] sm:$0x1] %vm129_vm2, %v195_v31 }
  0x39   :  { %v123_v37 = vrot.slane %v122_v36, 4 }
  0x3b   :  { %v124_v38 = vadd.f32 %v123_v37, %v122_v36 }
  0x3d   :  { %v125_v40 = vrot.slane %v124_v38, 2 }
  0x3f   :  { %v126_v41 = vadd.f32 %v125_v40, %v124_v38 }
  0x41   :  { %v127_v43 = vrot.slane %v126_v41, 1 }
  0x43   :  { %v128_v44 = vadd.f32 %v127_v43, %v126_v41 }
  0x45   :  { %v130_v46 = vsel %vm129_vm2, %v128_v44, 0.0 }
  0x46   :  { %131 = vadd.xlane.f32.xlu0 %v130_v46 }
  0x4e   :  { %141 = vadd.xlane.f32.xlu0 %v140_v48 }
  0xb9   :  { %v132_v49 = vpop.xlane.xlu0 %131 }
  0xba   :  { %v133_v50 = vrot.slane %v132_v49, 4 }
  0xbc   :  { %v134_v51 = vadd.f32 %v133_v50, %v132_v49 }
  0xbe   :  { %v135_v52 = vrot.slane %v134_v51, 2 }
  0xc0   :  { %v136_v53 = vadd.f32 %v135_v52, %v134_v51 }
  0xc1   :  { %v142_v54 = vpop.xlane.xlu0 %141 }
  0xc2   :  { %v143_v55 = vrot.slane %v142_v54, 4  ;;  %v137_v56 = vrot.slane %v136_v53, 1 }
  0xc4   :  { %v144_v57 = vadd.f32 %v143_v55, %v142_v54  ;;  %v138_v58 = vadd.f32 %v137_v56, %v136_v53 }
  0xc6   :  { %v145_v59 = vrot.slane %v144_v57, 2  ;;  %217 = vpush %v138_v58 }
  0xc8   :  { %v146_v60 = vadd.f32 %v145_v59, %v144_v57 }
  0xca   :  { %v147_v61 = vrot.slane %v146_v60, 1 }
  0xcc   :  { %v148_v62 = vadd.f32 %v147_v61, %v146_v60 }
  0xce   :  { %219 = vpush %v148_v62 }
  0xf7   :  { %s423_s11 = spop %217 }
  0xff   :  { %s220_s12 = spop %219 }
 0x100   :  { %s150_s13 = sadd.f32 1e-08, %s220_s12 }
 0x102   :  { %v151_v63 = vstv %s150_s13 }
 0x103   :  { %234 = vrcp.f32 %v151_v63  ;;  %v163_v4 = vand.u32 2147483648, %v151_v63  ;;  %v161_v6 = vand.u32 2147483647, %v151_v63  ;;  %vm157_vm4 = vweird.f32 %v151_v63 }
 0x104   :  { %236 = vrcp.f32 %v176_v1 }
 0x105   :  { %v164_v9 = vor.u32 1.1754944e-38, %v163_v4  ;;  %vm162_vm6 = vcmp.eq.f32.partialorder %v161_v6, 8.507059e+37 }
 0x109   :  { %v235_v0 = vpop.eup %234 }
 0x10a   :  { %v153_v2 = vmul.f32 %v235_v0, %v151_v63  ;;  %vm158_vm3 = vweird.f32 %v235_v0  ;;  %v237_v12 = vpop.eup %236 }
 0x10b   :  { %vm159_vm5 = vmor %vm157_vm4, %vm158_vm3  ;;  %v178_v14 = vmul.f32 %v237_v12, %v176_v1  ;;  %vm183_vm8 = vweird.f32 %v237_v12 }
 0x10c   :  { %v154_v3 = vsub.f32 1.0, %v153_v2  ;;  %vm184_vm9 = vmor %vm182_vm7, %vm183_vm8 }
 0x10d   :  { %v179_v16 = vsub.f32 1.0, %v178_v14 }
 0x10e   :  { %v155_v5 = vmul.f32 %v235_v0, %v154_v3 }
 0x10f   :  { %v180_v20 = vmul.f32 %v237_v12, %v179_v16 }
 0x110   :  { %v156_v7 = vadd.f32 %v235_v0, %v155_v5 }
 0x111   :  { %v181_v25 = vadd.f32 %v237_v12, %v180_v20 }
 0x112   :  { %v160_v10 = vsel %vm159_vm5, %v235_v0, %v156_v7 }
 0x113   :  { %v165_v11 = vsel %vm162_vm6, %v164_v9, %v160_v10  ;;  %v185_v27 = vsel %vm184_vm9, %v237_v12, %v181_v25 }
 0x114   :  { %221 = vpush %v165_v11  ;;  %v190_v29 = vsel %vm187_vm10, %v189_v24, %v185_v27 }
 0x115   :  { %v191_v30 = vmul.f32 %v190_v29, %v175_v17 }
 0x117   :  { %197 = vst.msk [vmem:[#allocation10 + $0x2] sm:$0x1] %vm129_vm2, %v191_v30 }
 0x145   :  { %s222_s20 = spop %221 }
 0x146   :  { %s167_s21 = smul.f32 %s222_s20, %s423_s11 }
 0x148   :  { %v192_v32 = vstv %s167_s21 }
 0x149   :  { %193 = vst.msk [vmem:[#allocation10] sm:$0x1] %vm129_vm2, %v192_v32 }
 0x14a   :  { %208 = dma.vmem_to_hbm [thread:$0]  %s204_s17, 64, %s206_s19, [#allocation4]  }
 0x14b   :  { %364 = dma.done.wait [#allocation4], 64  }
 0x14c   :  { %365 = vsyncadd [#allocation4], 4294967232 }
 0x14d   :  { %213 = vsyncpa [#allocation3], 1 }
 0x14e   :  { %214 = vsyncpa [#allocation6], 1 }
 0x14f   :  { %215 = vsyncpa [#allocation9], 1 }
 0x150   :  { %216 = vsyncpa [#allocation4], 1 }

</bundles_post_ra>
